<compile_context>
chip_gen: v7x
topology: tpu7x:2x2x1
jax: 0.10.0
libtpu: 0.0.40
codegen_flags: <defaults>
</compile_context>

<pallas_src>
import functools

import jax
import jax.numpy as jnp
from jax import lax
from jax.experimental import pallas as pl
from jax.experimental.pallas import tpu as pltpu


def _round_up(x, m):
    return -(-x // m) * m


def _eq_deconv2d_kernel(x_ref, w_ref, b_ref, o_ref, *, row_tile, chunk, nw, kk, s,
                        cdim, soc, scale_const):
    # x_ref : (1, hp, nw, cdim)          column-im2col'd, halo-padded input (resident)
    # w_ref : (s, kk, cdim, soc)         fused per-(row-phase, row-tap) weights
    # b_ref : (1, soc)                   bias * scale (zeros when no bias), f32
    # o_ref : (1, row_tile, s, nw, soc)  one coarse-row output tile (all row phases)
    row0 = pl.program_id(1) * row_tile
    bvec = b_ref[...]                                        # (1, soc), loaded once
    n_chunks = row_tile // chunk

    def chunk_body(c, carry):
        r0 = row0 + c * chunk
        # s separate accumulators: total f32 bytes = chunk * nw * (s*soc) * 4, bounded
        accs = [jnp.zeros((chunk * nw, soc), jnp.float32) for _ in range(s)]
        for dr in range(kk):                                 # static unroll: coarse row taps
            patch = x_ref[0, pl.ds(r0 + dr, chunk)]          # (chunk, nw, cdim) major-dim slice
            patch = patch.reshape(chunk * nw, cdim)          # layout no-op (nw % 8 == 0)
            for pi in range(s):                              # static unroll: output row phases
                accs[pi] = accs[pi] + jnp.dot(patch, w_ref[pi, dr],
                                              preferred_element_type=jnp.float32)
        for pi in range(s):
            out = accs[pi]
            if scale_const != 1.0:                           # only when scale not folded into W
                out = out * scale_const
            out = (out + bvec).reshape(chunk, nw, soc).astype(o_ref.dtype)
            o_ref[0, pl.ds(c * chunk, chunk), pi] = out
        return carry

    if n_chunks == 1:
        chunk_body(0, 0)
    else:
        lax.fori_loop(0, n_chunks, chunk_body, 0, unroll=n_chunks <= 2)


def eq_deconv2d(x, weight, s, p, bias=None, *, row_tile=None, chunk=None):
    """Equalized-lr ConvTranspose2d: (conv_transpose2d(x, W, bias, s, p)) * scale.

    x: (N, ic, H, W) NCHW; weight: (ic, oc, k, k); bias: (oc,) or None.
    Returns (N, oc, Hout, Wout), Hout = (H-1)*s - 2*p + k.
    """
    n, ic, h, w = x.shape
    ic_w, oc, k, k2 = weight.shape
    assert ic == ic_w and k == k2 and s >= 1 and 0 <= p <= k - 1
    scale = 1.0 * ((ic + oc) * k * k / 2.0) ** (-0.5)        # calculate_gain('conv2d') == 1
    hout = (h - 1) * s - 2 * p + k
    wout = (w - 1) * s - 2 * p + k
    pad = k - 1 - p

    # ---- sub-pixel phase metadata (rows == cols: square k, s, p) ----
    # output index i = s*ih + ph uses kernel taps a = a0 + s*m and input rows ih + d + m.
    phases = []
    for ph in range(s):
        a0 = (pad - ph) % s
        m_cnt = (k - a0 + s - 1) // s if a0 < k else 0
        d = (ph + a0 - pad) // s
        phases.append((a0, d, m_cnt))
    live = [(a0, d, m) for (a0, d, m) in phases if m > 0]
    r_lo = min(d for _, d, m in live)
    r_hi = max(d + m - 1 for _, d, m in live)
    kk = r_hi - r_lo + 1                                     # coarse receptive field / axis
    nh = -(-hout // s)                                       # coarse (pre-shuffle) rows
    nw = _round_up(-(-wout // s), 8)                         # coarse cols, sublane-aligned
    cdim = kk * ic                                           # fused contraction width
    soc = s * oc                                             # per-row-phase output width
    feat = s * soc
    itemsize = jnp.dtype(x.dtype).itemsize

    # ---- tile sizing: bound live f32 acc to ~128 KiB, keep large output DMA blocks ----
    acc_row_bytes = nw * feat * 4
    chunk_cap = max(1, (128 << 10) // acc_row_bytes)
    if row_tile is not None:
        row_tile = int(row_tile)
        if chunk is None:
            chunk = next(d for d in range(max(1, min(chunk_cap, row_tile)), 0, -1)
                         if row_tile % d == 0)
    else:
        nh8 = _round_up(nh, 8)
        if chunk is None:
            chunk = next(d for d in range(max(1, min(chunk_cap, nh8)), 0, -1)
                         if nh8 % d == 0)
        chunk = max(1, int(chunk))
        out_row_bytes = s * nw * soc * itemsize
        rows_budget = max(chunk, ((1 << 20) // max(1, out_row_bytes)) // chunk * chunk)
        start = max(chunk, (min(nh8, rows_budget) // chunk) * chunk)
        cands = [t for t in range(start, 0, -chunk) if nh8 % t == 0]
        row_tile = cands[0] if cands else start
    chunk = max(1, int(chunk))
    if row_tile % chunk != 0:                                # user forced incompatible pair
        chunk = next(d for d in range(min(chunk, row_tile), 0, -1) if row_tile % d == 0)
    nh_pad = _round_up(nh, row_tile)
    n_row_tiles = nh_pad // row_tile
    hp = nh_pad + kk - 1
    wp = nw + kk - 1

    # ---- halo-pad the ORIGINAL input (no zero-dilation) + column im2col ----
    x_nhwc = jnp.transpose(x, (0, 2, 3, 1))
    pt = -r_lo                                               # >= 0
    pb = max(0, hp - pt - h)
    pr = max(0, wp - pt - w)
    x_pad = jnp.pad(x_nhwc, ((0, 0), (pt, pb), (pt, pr), (0, 0)))[:, :hp, :wp, :]
    # x_cols[b, r, j, dc*ic + c] = x_pad[b, r, j + dc, c]  (all kk column taps fused)
    x_cols = jnp.concatenate([x_pad[:, :, dc:dc + nw, :] for dc in range(kk)], axis=-1)

    # ---- fused weights: (s, kk, kk*ic, s*oc), spatially flipped ----
    fold_scale = jnp.dtype(weight.dtype) == jnp.dtype(jnp.float32)
    w_flip = jnp.flip(weight, axis=(2, 3))                   # w_flip[..,a,b] = W[..,k-1-a,k-1-b]
    w_taps = jnp.zeros((s, kk, kk, ic, s, oc), weight.dtype)
    for pi, (a0i, di, mi) in enumerate(phases):
        for pj, (a0j, dj, mj) in enumerate(phases):
            for m in range(mi):
                for nn in range(mj):
                    a, b = a0i + s * m, a0j + s * nn
                    dr, dc = di + m - r_lo, dj + nn - r_lo
                    w_taps = w_taps.at[pi, dr, dc, :, pj, :].set(w_flip[:, :, a, b])
    if fold_scale:
        w_taps = w_taps * jnp.asarray(scale, w_taps.dtype)
    w_taps = w_taps.reshape(s, kk, cdim, soc)
    scale_const = 1.0 if fold_scale else float(scale)

    # ---- bias * scale, replicated over column phases (fused epilogue in-kernel) ----
    if bias is not None:
        b_vec = jnp.tile(bias.astype(jnp.float32) * scale, s).reshape(1, soc)
    else:
        b_vec = jnp.zeros((1, soc), jnp.float32)

    # ---- explicit VMEM budget (double-buffered operands counted), per-gen cap ----
    in_bytes = hp * nw * cdim * itemsize
    w_bytes = s * kk * cdim * soc * jnp.dtype(w_taps.dtype).itemsize
    out_bytes = row_tile * s * nw * soc * itemsize
    acc_bytes = chunk * nw * feat * 4 + chunk * nw * cdim * itemsize
    vmem_est = 2 * (in_bytes + w_bytes + out_bytes + soc * 4) + acc_bytes
    try:
        vmem_cap = int(pltpu.get_tpu_info().vmem_capacity_bytes)
    except Exception:
        vmem_cap = 64 << 20                                  # conservative (v7x per-TC)
    vmem_limit = int(min((3 * vmem_cap) // 4, max(32 << 20, 2 * vmem_est)))

    kernel = functools.partial(
        _eq_deconv2d_kernel, row_tile=row_tile, chunk=chunk, nw=nw, kk=kk, s=s,
        cdim=cdim, soc=soc, scale_const=scale_const)

    out = pl.pallas_call(
        kernel,
        out_shape=jax.ShapeDtypeStruct((n, nh_pad, s, nw, soc), x.dtype),
        grid_spec=pltpu.PrefetchScalarGridSpec(
            num_scalar_prefetch=0,
            grid=(n, n_row_tiles),
            in_specs=[
                # whole (small) im2col'd image per batch elem; constant across row tiles
                pl.BlockSpec((1, hp, nw, cdim), lambda b, t: (b, 0, 0, 0)),
                pl.BlockSpec((s, kk, cdim, soc), lambda b, t: (0, 0, 0, 0)),
                pl.BlockSpec((1, soc), lambda b, t: (0, 0)),
            ],
            out_specs=pl.BlockSpec((1, row_tile, s, nw, soc),
                                   lambda b, t: (b, t, 0, 0, 0)),
        ),
        compiler_params=pltpu.CompilerParams(
            dimension_semantics=("parallel", "parallel"),
            vmem_limit_bytes=vmem_limit),
    )(x_cols, w_taps, b_vec)

    # ---- pixel shuffle is a pure reshape (no transpose pass); crop; back to NCHW ----
    out = out.reshape(n, nh_pad * s, nw * s, oc)[:, :hout, :wout, :]
    return jnp.transpose(out, (0, 3, 1, 2))


if __name__ == "__main__":
    key = jax.random.PRNGKey(0)
    kx, kw, kb, kx2 = jax.random.split(key, 4)

    # module config: EqDeconv2d(ic=4, oc=32, k=4, s=2, p=1)
    N, IC, OC, K, S, P, H, W = 2, 4, 32, 4, 2, 1, 16, 16
    x = jax.random.normal(kx, (N, IC, H, W), jnp.float32)
    weight = jax.random.normal(kw, (IC, OC, K, K), jnp.float32)   # ~ torch.randn(ic, oc, k, k)
    bias = jax.random.normal(kb, (OC,), jnp.float32)

    scale = ((IC + OC) * K * K / 2.0) ** (-0.5)
    rhs = jnp.transpose(jnp.flip(weight, (2, 3)), (1, 0, 2, 3))   # (oc, ic, k, k)

    def ref_deconv(xx):
        return lax.conv_general_dilated(
            xx, rhs, window_strides=(1, 1),
            padding=[(K - 1 - P, K - 1 - P)] * 2,
            lhs_dilation=(S, S),
            dimension_numbers=("NCHW", "OIHW", "NCHW")) * scale

    HOUT = (H - 1) * S - 2 * P + K
    ref = ref_deconv(x)

    # (1) explicit row-tiled + sub-chunked path (2 row tiles x 2 chunks), no bias
    out = jax.block_until_ready(eq_deconv2d(x, weight, S, P, bias=None, row_tile=8, chunk=4))
    assert out.shape == (N, OC, HOUT, HOUT)
    assert jnp.allclose(out, ref, atol=1e-4, rtol=1e-4)

    # (2) default auto-tiling + fused bias epilogue
    out_b = jax.block_until_ready(eq_deconv2d(x, weight, S, P, bias=bias))
    ref_b = ref + (bias * scale)[None, :, None, None]
    assert jnp.allclose(out_b, ref_b, atol=1e-4, rtol=1e-4)

    # (3) odd spatial size: exercises nh/nw padding + output cropping
    H2 = W2 = 15
    x2 = jax.random.normal(kx2, (N, IC, H2, W2), jnp.float32)
    out2 = jax.block_until_ready(eq_deconv2d(x2, weight, S, P, bias=bias, row_tile=8))
    ref2 = ref_deconv(x2) + (bias * scale)[None, :, None, None]
    HOUT2 = (H2 - 1) * S - 2 * P + K
    assert out2.shape == (N, OC, HOUT2, HOUT2)
    assert jnp.allclose(out2, ref2, atol=1e-4, rtol=1e-4)

    print("KERNEL_OK")
</pallas_src>

<mosaic_0001>
module attributes {stable_mosaic.version = 11 : i64} {
  func.func @_eq_deconv2d_kernel(%arg0: i32, %arg1: i32, %arg2: memref<1x18x16x12xf32, #tpu.memory_space<vmem>>, %arg3: memref<2x3x12x64xf32, #tpu.memory_space<vmem>>, %arg4: memref<1x64xf32, #tpu.memory_space<vmem>>, %arg5: memref<1x8x2x16x64xf32, #tpu.memory_space<vmem>>) attributes {dimension_semantics = [#tpu.dimension_semantics<parallel>, #tpu.dimension_semantics<parallel>], iteration_bounds = array<i64: 2, 2>, scalar_prefetch = 0 : i64, scratch_operands = 0 : i64, tpu.core_type = #tpu.core_type<tc>, window_params = [{transform_indices = @transform_0, window_bounds = array<i64: 1, 18, 16, 12>}, {pipeline_mode = #tpu.pipeline_mode<synchronous>, transform_indices = @transform_1, window_bounds = array<i64: 2, 3, 12, 64>}, {pipeline_mode = #tpu.pipeline_mode<synchronous>, transform_indices = @transform_2, window_bounds = array<i64: 1, 64>}, {transform_indices = @transform_3, window_bounds = array<i64: 1, 8, 2, 16, 64>}]} {
    %c8_i32 = arith.constant 8 : i32
    %0 = arith.muli %arg1, %c8_i32 : i32
    %c0 = arith.constant 0 : index
    %c0_0 = arith.constant 0 : index
    %1 = vector.load %arg4[%c0, %c0_0] : memref<1x64xf32, #tpu.memory_space<vmem>>, vector<1x64xf32>
    %c0_i32 = arith.constant 0 : i32
    %c4_i32 = arith.constant 4 : i32
    %2 = arith.muli %c0_i32, %c4_i32 : i32
    %3 = arith.addi %0, %2 : i32
    %cst = arith.constant 0.000000e+00 : f32
    %4 = vector.broadcast %cst : f32 to vector<64x64xf32>
    %cst_1 = arith.constant 0.000000e+00 : f32
    %5 = vector.broadcast %cst_1 : f32 to vector<64x64xf32>
    %c0_i32_2 = arith.constant 0 : i32
    %6 = arith.addi %3, %c0_i32_2 : i32
    %c0_3 = arith.constant 0 : index
    %7 = arith.index_cast %6 : i32 to index
    %c0_4 = arith.constant 0 : index
    %c0_5 = arith.constant 0 : index
    %8 = vector.load %arg2[%c0_3, %7, %c0_4, %c0_5] : memref<1x18x16x12xf32, #tpu.memory_space<vmem>>, vector<1x4x16x12xf32>
    %9 = vector.shape_cast %8 : vector<1x4x16x12xf32> to vector<4x16x12xf32>
    %10 = vector.shape_cast %9 : vector<4x16x12xf32> to vector<64x12xf32>
    %c0_6 = arith.constant 0 : index
    %c0_7 = arith.constant 0 : index
    %c0_8 = arith.constant 0 : index
    %c0_9 = arith.constant 0 : index
    %11 = vector.load %arg3[%c0_6, %c0_7, %c0_8, %c0_9] : memref<2x3x12x64xf32, #tpu.memory_space<vmem>>, vector<1x1x12x64xf32>
    %12 = vector.shape_cast %11 : vector<1x1x12x64xf32> to vector<12x64xf32>
    %cst_10 = arith.constant dense<0.000000e+00> : vector<64x64xf32>
    %13 = tpu.matmul %10, %12, %cst_10 {dimension_numbers = #tpu.dot_dimension_numbers<[1], [0], [0], [1], [0, 0, 1, 1], [], []>} : vector<64x12xf32>, vector<12x64xf32>, vector<64x64xf32> -> vector<64x64xf32>
    %14 = arith.addf %4, %13 : vector<64x64xf32>
    %c1 = arith.constant 1 : index
    %c0_11 = arith.constant 0 : index
    %c0_12 = arith.constant 0 : index
    %c0_13 = arith.constant 0 : index
    %15 = vector.load %arg3[%c1, %c0_11, %c0_12, %c0_13] : memref<2x3x12x64xf32, #tpu.memory_space<vmem>>, vector<1x1x12x64xf32>
    %16 = vector.shape_cast %15 : vector<1x1x12x64xf32> to vector<12x64xf32>
    %cst_14 = arith.constant dense<0.000000e+00> : vector<64x64xf32>
    %17 = tpu.matmul %10, %16, %cst_14 {dimension_numbers = #tpu.dot_dimension_numbers<[1], [0], [0], [1], [0, 0, 1, 1], [], []>} : vector<64x12xf32>, vector<12x64xf32>, vector<64x64xf32> -> vector<64x64xf32>
    %18 = arith.addf %5, %17 : vector<64x64xf32>
    %c1_i32 = arith.constant 1 : i32
    %19 = arith.addi %3, %c1_i32 : i32
    %c0_15 = arith.constant 0 : index
    %20 = arith.index_cast %19 : i32 to index
    %c0_16 = arith.constant 0 : index
    %c0_17 = arith.constant 0 : index
    %21 = vector.load %arg2[%c0_15, %20, %c0_16, %c0_17] : memref<1x18x16x12xf32, #tpu.memory_space<vmem>>, vector<1x4x16x12xf32>
    %22 = vector.shape_cast %21 : vector<1x4x16x12xf32> to vector<4x16x12xf32>
    %23 = vector.shape_cast %22 : vector<4x16x12xf32> to vector<64x12xf32>
    %c0_18 = arith.constant 0 : index
    %c1_19 = arith.constant 1 : index
    %c0_20 = arith.constant 0 : index
    %c0_21 = arith.constant 0 : index
    %24 = vector.load %arg3[%c0_18, %c1_19, %c0_20, %c0_21] : memref<2x3x12x64xf32, #tpu.memory_space<vmem>>, vector<1x1x12x64xf32>
    %25 = vector.shape_cast %24 : vector<1x1x12x64xf32> to vector<12x64xf32>
    %cst_22 = arith.constant dense<0.000000e+00> : vector<64x64xf32>
    %26 = tpu.matmul %23, %25, %cst_22 {dimension_numbers = #tpu.dot_dimension_numbers<[1], [0], [0], [1], [0, 0, 1, 1], [], []>} : vector<64x12xf32>, vector<12x64xf32>, vector<64x64xf32> -> vector<64x64xf32>
    %27 = arith.addf %14, %26 : vector<64x64xf32>
    %c1_23 = arith.constant 1 : index
    %c1_24 = arith.constant 1 : index
    %c0_25 = arith.constant 0 : index
    %c0_26 = arith.constant 0 : index
    %28 = vector.load %arg3[%c1_23, %c1_24, %c0_25, %c0_26] : memref<2x3x12x64xf32, #tpu.memory_space<vmem>>, vector<1x1x12x64xf32>
    %29 = vector.shape_cast %28 : vector<1x1x12x64xf32> to vector<12x64xf32>
    %cst_27 = arith.constant dense<0.000000e+00> : vector<64x64xf32>
    %30 = tpu.matmul %23, %29, %cst_27 {dimension_numbers = #tpu.dot_dimension_numbers<[1], [0], [0], [1], [0, 0, 1, 1], [], []>} : vector<64x12xf32>, vector<12x64xf32>, vector<64x64xf32> -> vector<64x64xf32>
    %31 = arith.addf %18, %30 : vector<64x64xf32>
    %c2_i32 = arith.constant 2 : i32
    %32 = arith.addi %3, %c2_i32 : i32
    %c0_28 = arith.constant 0 : index
    %33 = arith.index_cast %32 : i32 to index
    %c0_29 = arith.constant 0 : index
    %c0_30 = arith.constant 0 : index
    %34 = vector.load %arg2[%c0_28, %33, %c0_29, %c0_30] : memref<1x18x16x12xf32, #tpu.memory_space<vmem>>, vector<1x4x16x12xf32>
    %35 = vector.shape_cast %34 : vector<1x4x16x12xf32> to vector<4x16x12xf32>
    %36 = vector.shape_cast %35 : vector<4x16x12xf32> to vector<64x12xf32>
    %c0_31 = arith.constant 0 : index
    %c2 = arith.constant 2 : index
    %c0_32 = arith.constant 0 : index
    %c0_33 = arith.constant 0 : index
    %37 = vector.load %arg3[%c0_31, %c2, %c0_32, %c0_33] : memref<2x3x12x64xf32, #tpu.memory_space<vmem>>, vector<1x1x12x64xf32>
    %38 = vector.shape_cast %37 : vector<1x1x12x64xf32> to vector<12x64xf32>
    %cst_34 = arith.constant dense<0.000000e+00> : vector<64x64xf32>
    %39 = tpu.matmul %36, %38, %cst_34 {dimension_numbers = #tpu.dot_dimension_numbers<[1], [0], [0], [1], [0, 0, 1, 1], [], []>} : vector<64x12xf32>, vector<12x64xf32>, vector<64x64xf32> -> vector<64x64xf32>
    %40 = arith.addf %27, %39 : vector<64x64xf32>
    %c1_35 = arith.constant 1 : index
    %c2_36 = arith.constant 2 : index
    %c0_37 = arith.constant 0 : index
    %c0_38 = arith.constant 0 : index
    %41 = vector.load %arg3[%c1_35, %c2_36, %c0_37, %c0_38] : memref<2x3x12x64xf32, #tpu.memory_space<vmem>>, vector<1x1x12x64xf32>
    %42 = vector.shape_cast %41 : vector<1x1x12x64xf32> to vector<12x64xf32>
    %cst_39 = arith.constant dense<0.000000e+00> : vector<64x64xf32>
    %43 = tpu.matmul %36, %42, %cst_39 {dimension_numbers = #tpu.dot_dimension_numbers<[1], [0], [0], [1], [0, 0, 1, 1], [], []>} : vector<64x12xf32>, vector<12x64xf32>, vector<64x64xf32> -> vector<64x64xf32>
    %44 = arith.addf %31, %43 : vector<64x64xf32>
    %45 = vector.broadcast %1 : vector<1x64xf32> to vector<64x64xf32>
    %46 = arith.addf %40, %45 : vector<64x64xf32>
    %47 = vector.shape_cast %46 : vector<64x64xf32> to vector<4x16x64xf32>
    %c4_i32_40 = arith.constant 4 : i32
    %48 = arith.muli %c0_i32, %c4_i32_40 : i32
    %c0_41 = arith.constant 0 : index
    %49 = arith.index_cast %48 : i32 to index
    %c0_42 = arith.constant 0 : index
    %c0_43 = arith.constant 0 : index
    %c0_44 = arith.constant 0 : index
    %50 = vector.load %arg5[%c0_41, %49, %c0_42, %c0_43, %c0_44] : memref<1x8x2x16x64xf32, #tpu.memory_space<vmem>>, vector<1x4x1x16x64xf32>
    %51 = vector.shape_cast %50 : vector<1x4x1x16x64xf32> to vector<4x16x64xf32>
    %52 = vector.shape_cast %47 : vector<4x16x64xf32> to vector<1x4x1x16x64xf32>
    tpu.vector_store %arg5[%c0_41, %49, %c0_42, %c0_43, %c0_44], %52 {strides = array<i32>} : memref<1x8x2x16x64xf32, #tpu.memory_space<vmem>>, vector<1x4x1x16x64xf32>,
    %53 = vector.broadcast %1 : vector<1x64xf32> to vector<64x64xf32>
    %54 = arith.addf %44, %53 : vector<64x64xf32>
    %55 = vector.shape_cast %54 : vector<64x64xf32> to vector<4x16x64xf32>
    %c4_i32_45 = arith.constant 4 : i32
    %56 = arith.muli %c0_i32, %c4_i32_45 : i32
    %c0_46 = arith.constant 0 : index
    %57 = arith.index_cast %56 : i32 to index
    %c1_47 = arith.constant 1 : index
    %c0_48 = arith.constant 0 : index
    %c0_49 = arith.constant 0 : index
    %58 = vector.load %arg5[%c0_46, %57, %c1_47, %c0_48, %c0_49] : memref<1x8x2x16x64xf32, #tpu.memory_space<vmem>>, vector<1x4x1x16x64xf32>
    %59 = vector.shape_cast %58 : vector<1x4x1x16x64xf32> to vector<4x16x64xf32>
    %60 = vector.shape_cast %55 : vector<4x16x64xf32> to vector<1x4x1x16x64xf32>
    tpu.vector_store %arg5[%c0_46, %57, %c1_47, %c0_48, %c0_49], %60 {strides = array<i32>} : memref<1x8x2x16x64xf32, #tpu.memory_space<vmem>>, vector<1x4x1x16x64xf32>,
    %c1_i32_50 = arith.constant 1 : i32
    %c4_i32_51 = arith.constant 4 : i32
    %61 = arith.muli %c1_i32_50, %c4_i32_51 : i32
    %62 = arith.addi %0, %61 : i32
    %cst_52 = arith.constant 0.000000e+00 : f32
    %63 = vector.broadcast %cst_52 : f32 to vector<64x64xf32>
    %cst_53 = arith.constant 0.000000e+00 : f32
    %64 = vector.broadcast %cst_53 : f32 to vector<64x64xf32>
    %c0_i32_54 = arith.constant 0 : i32
    %65 = arith.addi %62, %c0_i32_54 : i32
    %c0_55 = arith.constant 0 : index
    %66 = arith.index_cast %65 : i32 to index
    %c0_56 = arith.constant 0 : index
    %c0_57 = arith.constant 0 : index
    %67 = vector.load %arg2[%c0_55, %66, %c0_56, %c0_57] : memref<1x18x16x12xf32, #tpu.memory_space<vmem>>, vector<1x4x16x12xf32>
    %68 = vector.shape_cast %67 : vector<1x4x16x12xf32> to vector<4x16x12xf32>
    %69 = vector.shape_cast %68 : vector<4x16x12xf32> to vector<64x12xf32>
    %c0_58 = arith.constant 0 : index
    %c0_59 = arith.constant 0 : index
    %c0_60 = arith.constant 0 : index
    %c0_61 = arith.constant 0 : index
    %70 = vector.load %arg3[%c0_58, %c0_59, %c0_60, %c0_61] : memref<2x3x12x64xf32, #tpu.memory_space<vmem>>, vector<1x1x12x64xf32>
    %71 = vector.shape_cast %70 : vector<1x1x12x64xf32> to vector<12x64xf32>
    %cst_62 = arith.constant dense<0.000000e+00> : vector<64x64xf32>
    %72 = tpu.matmul %69, %71, %cst_62 {dimension_numbers = #tpu.dot_dimension_numbers<[1], [0], [0], [1], [0, 0, 1, 1], [], []>} : vector<64x12xf32>, vector<12x64xf32>, vector<64x64xf32> -> vector<64x64xf32>
    %73 = arith.addf %63, %72 : vector<64x64xf32>
    %c1_63 = arith.constant 1 : index
    %c0_64 = arith.constant 0 : index
    %c0_65 = arith.constant 0 : index
    %c0_66 = arith.constant 0 : index
    %74 = vector.load %arg3[%c1_63, %c0_64, %c0_65, %c0_66] : memref<2x3x12x64xf32, #tpu.memory_space<vmem>>, vector<1x1x12x64xf32>
    %75 = vector.shape_cast %74 : vector<1x1x12x64xf32> to vector<12x64xf32>
    %cst_67 = arith.constant dense<0.000000e+00> : vector<64x64xf32>
    %76 = tpu.matmul %69, %75, %cst_67 {dimension_numbers = #tpu.dot_dimension_numbers<[1], [0], [0], [1], [0, 0, 1, 1], [], []>} : vector<64x12xf32>, vector<12x64xf32>, vector<64x64xf32> -> vector<64x64xf32>
    %77 = arith.addf %64, %76 : vector<64x64xf32>
    %c1_i32_68 = arith.constant 1 : i32
    %78 = arith.addi %62, %c1_i32_68 : i32
    %c0_69 = arith.constant 0 : index
    %79 = arith.index_cast %78 : i32 to index
    %c0_70 = arith.constant 0 : index
    %c0_71 = arith.constant 0 : index
    %80 = vector.load %arg2[%c0_69, %79, %c0_70, %c0_71] : memref<1x18x16x12xf32, #tpu.memory_space<vmem>>, vector<1x4x16x12xf32>
    %81 = vector.shape_cast %80 : vector<1x4x16x12xf32> to vector<4x16x12xf32>
    %82 = vector.shape_cast %81 : vector<4x16x12xf32> to vector<64x12xf32>
    %c0_72 = arith.constant 0 : index
    %c1_73 = arith.constant 1 : index
    %c0_74 = arith.constant 0 : index
    %c0_75 = arith.constant 0 : index
    %83 = vector.load %arg3[%c0_72, %c1_73, %c0_74, %c0_75] : memref<2x3x12x64xf32, #tpu.memory_space<vmem>>, vector<1x1x12x64xf32>
    %84 = vector.shape_cast %83 : vector<1x1x12x64xf32> to vector<12x64xf32>
    %cst_76 = arith.constant dense<0.000000e+00> : vector<64x64xf32>
    %85 = tpu.matmul %82, %84, %cst_76 {dimension_numbers = #tpu.dot_dimension_numbers<[1], [0], [0], [1], [0, 0, 1, 1], [], []>} : vector<64x12xf32>, vector<12x64xf32>, vector<64x64xf32> -> vector<64x64xf32>
    %86 = arith.addf %73, %85 : vector<64x64xf32>
    %c1_77 = arith.constant 1 : index
    %c1_78 = arith.constant 1 : index
    %c0_79 = arith.constant 0 : index
    %c0_80 = arith.constant 0 : index
    %87 = vector.load %arg3[%c1_77, %c1_78, %c0_79, %c0_80] : memref<2x3x12x64xf32, #tpu.memory_space<vmem>>, vector<1x1x12x64xf32>
    %88 = vector.shape_cast %87 : vector<1x1x12x64xf32> to vector<12x64xf32>
    %cst_81 = arith.constant dense<0.000000e+00> : vector<64x64xf32>
    %89 = tpu.matmul %82, %88, %cst_81 {dimension_numbers = #tpu.dot_dimension_numbers<[1], [0], [0], [1], [0, 0, 1, 1], [], []>} : vector<64x12xf32>, vector<12x64xf32>, vector<64x64xf32> -> vector<64x64xf32>
    %90 = arith.addf %77, %89 : vector<64x64xf32>
    %c2_i32_82 = arith.constant 2 : i32
    %91 = arith.addi %62, %c2_i32_82 : i32
    %c0_83 = arith.constant 0 : index
    %92 = arith.index_cast %91 : i32 to index
    %c0_84 = arith.constant 0 : index
    %c0_85 = arith.constant 0 : index
    %93 = vector.load %arg2[%c0_83, %92, %c0_84, %c0_85] : memref<1x18x16x12xf32, #tpu.memory_space<vmem>>, vector<1x4x16x12xf32>
    %94 = vector.shape_cast %93 : vector<1x4x16x12xf32> to vector<4x16x12xf32>
    %95 = vector.shape_cast %94 : vector<4x16x12xf32> to vector<64x12xf32>
    %c0_86 = arith.constant 0 : index
    %c2_87 = arith.constant 2 : index
    %c0_88 = arith.constant 0 : index
    %c0_89 = arith.constant 0 : index
    %96 = vector.load %arg3[%c0_86, %c2_87, %c0_88, %c0_89] : memref<2x3x12x64xf32, #tpu.memory_space<vmem>>, vector<1x1x12x64xf32>
    %97 = vector.shape_cast %96 : vector<1x1x12x64xf32> to vector<12x64xf32>
    %cst_90 = arith.constant dense<0.000000e+00> : vector<64x64xf32>
    %98 = tpu.matmul %95, %97, %cst_90 {dimension_numbers = #tpu.dot_dimension_numbers<[1], [0], [0], [1], [0, 0, 1, 1], [], []>} : vector<64x12xf32>, vector<12x64xf32>, vector<64x64xf32> -> vector<64x64xf32>
    %99 = arith.addf %86, %98 : vector<64x64xf32>
    %c1_91 = arith.constant 1 : index
    %c2_92 = arith.constant 2 : index
    %c0_93 = arith.constant 0 : index
    %c0_94 = arith.constant 0 : index
    %100 = vector.load %arg3[%c1_91, %c2_92, %c0_93, %c0_94] : memref<2x3x12x64xf32, #tpu.memory_space<vmem>>, vector<1x1x12x64xf32>
    %101 = vector.shape_cast %100 : vector<1x1x12x64xf32> to vector<12x64xf32>
    %cst_95 = arith.constant dense<0.000000e+00> : vector<64x64xf32>
    %102 = tpu.matmul %95, %101, %cst_95 {dimension_numbers = #tpu.dot_dimension_numbers<[1], [0], [0], [1], [0, 0, 1, 1], [], []>} : vector<64x12xf32>, vector<12x64xf32>, vector<64x64xf32> -> vector<64x64xf32>
    %103 = arith.addf %90, %102 : vector<64x64xf32>
    %104 = vector.broadcast %1 : vector<1x64xf32> to vector<64x64xf32>
    %105 = arith.addf %99, %104 : vector<64x64xf32>
    %106 = vector.shape_cast %105 : vector<64x64xf32> to vector<4x16x64xf32>
    %c4_i32_96 = arith.constant 4 : i32
    %107 = arith.muli %c1_i32_50, %c4_i32_96 : i32
    %c0_97 = arith.constant 0 : index
    %108 = arith.index_cast %107 : i32 to index
    %c0_98 = arith.constant 0 : index
    %c0_99 = arith.constant 0 : index
    %c0_100 = arith.constant 0 : index
    %109 = vector.load %arg5[%c0_97, %108, %c0_98, %c0_99, %c0_100] : memref<1x8x2x16x64xf32, #tpu.memory_space<vmem>>, vector<1x4x1x16x64xf32>
    %110 = vector.shape_cast %109 : vector<1x4x1x16x64xf32> to vector<4x16x64xf32>
    %111 = vector.shape_cast %106 : vector<4x16x64xf32> to vector<1x4x1x16x64xf32>
    tpu.vector_store %arg5[%c0_97, %108, %c0_98, %c0_99, %c0_100], %111 {strides = array<i32>} : memref<1x8x2x16x64xf32, #tpu.memory_space<vmem>>, vector<1x4x1x16x64xf32>,
    %112 = vector.broadcast %1 : vector<1x64xf32> to vector<64x64xf32>
    %113 = arith.addf %103, %112 : vector<64x64xf32>
    %114 = vector.shape_cast %113 : vector<64x64xf32> to vector<4x16x64xf32>
    %c4_i32_101 = arith.constant 4 : i32
    %115 = arith.muli %c1_i32_50, %c4_i32_101 : i32
    %c0_102 = arith.constant 0 : index
    %116 = arith.index_cast %115 : i32 to index
    %c1_103 = arith.constant 1 : index
    %c0_104 = arith.constant 0 : index
    %c0_105 = arith.constant 0 : index
    %117 = vector.load %arg5[%c0_102, %116, %c1_103, %c0_104, %c0_105] : memref<1x8x2x16x64xf32, #tpu.memory_space<vmem>>, vector<1x4x1x16x64xf32>
    %118 = vector.shape_cast %117 : vector<1x4x1x16x64xf32> to vector<4x16x64xf32>
    %119 = vector.shape_cast %114 : vector<4x16x64xf32> to vector<1x4x1x16x64xf32>
    tpu.vector_store %arg5[%c0_102, %116, %c1_103, %c0_104, %c0_105], %119 {strides = array<i32>} : memref<1x8x2x16x64xf32, #tpu.memory_space<vmem>>, vector<1x4x1x16x64xf32>,
    %c2_i32_106 = arith.constant 2 : i32
    return
  }
  func.func @transform_0(%arg0: i32, %arg1: i32) -> (i32, i32, i32, i32) {
    %c0_i32 = arith.constant 0 : i32
    %c0_i32_0 = arith.constant 0 : i32
    %c0_i32_1 = arith.constant 0 : i32
    %c0_i32_2 = arith.constant 0 : i32
    return %arg0, %c0_i32, %c0_i32_0, %c0_i32_1 : i32, i32, i32, i32
  }
  func.func @transform_1(%arg0: i32, %arg1: i32) -> (i32, i32, i32, i32) {
    %c0_i32 = arith.constant 0 : i32
    %c0_i32_0 = arith.constant 0 : i32
    %c0_i32_1 = arith.constant 0 : i32
    %c0_i32_2 = arith.constant 0 : i32
    %c0_i32_3 = arith.constant 0 : i32
    return %c0_i32, %c0_i32_0, %c0_i32_1, %c0_i32_2 : i32, i32, i32, i32
  }
  func.func @transform_2(%arg0: i32, %arg1: i32) -> (i32, i32) {
    %c0_i32 = arith.constant 0 : i32
    %c0_i32_0 = arith.constant 0 : i32
    %c0_i32_1 = arith.constant 0 : i32
    return %c0_i32, %c0_i32_0 : i32, i32
  }
  func.func @transform_3(%arg0: i32, %arg1: i32) -> (i32, i32, i32, i32, i32) {
    %c0_i32 = arith.constant 0 : i32
    %c0_i32_0 = arith.constant 0 : i32
    %c0_i32_1 = arith.constant 0 : i32
    %c0_i32_2 = arith.constant 0 : i32
    return %arg0, %arg1, %c0_i32, %c0_i32_0, %c0_i32_1 : i32, i32, i32, i32, i32
  }
}

</mosaic_0001>

<bundles_post_ra>
// kernel: tpu_custom_call.1
= control target key start
LH: loop header
LB: loop body
LE: loop exit
PB: predicated region body
PF: predicated region fallthrough
CT: control target
= control target key end

     0   :  { %8 = vsyncpa [#allocation3], 0  ;;  %s3323_s0 = inlined_call_operand.vmem [shape: f32[2,18,16,12], index: 0, kind: input, shape index: {}]   ;;  %s3324_s1 = inlined_call_operand.vmem [shape: f32[2,3,12,64], index: 1, kind: input, shape index: {}]   ;;  %s3325_s2 = inlined_call_operand.vmem [shape: f32[1,64], index: 2, kind: input, shape index: {}]   ;;  %s3326_s3 = inlined_call_operand.hbm [shape: f32[2,16,2,16,64], index: 3, kind: output, shape index: {}]  }
   0x1   :  { %10 = vsyncpa [#allocation3 + $0x1], 0  ;;  %s2812_s12 = smov 0   ;;  %s2814_s13 = smov 0  }
   0x2   :  { %s2816_s14 = smov 0   ;;  %s2818_s15 = smov 0  }
   0x3   :  { %s2820_s16 = smov 0   ;;  %s2822_s17 = smov 0  }
   0x4   :  { %s2824_s18 = smov 0   ;;  %s2826_s19 = smov 0  }
   0x5 LB: > { %s1943_s20 = sadd.s32 4294967295, %s2786_s19   ;;  %s1944_s21 = sadd.s32 4294967294, %s2786_s19   ;;  %s2786_s19 = sphi %s2826_s19, %s16_s19   ;;  %s2782_s18 = sphi %s2824_s18, %s3337_s18   ;;  %s2778_s17 = sphi %s2822_s17, %s3336_s17   ;;  %s2774_s16 = sphi %s2820_s16, %s3335_s16   ;;  %s2770_s15 = sphi %s2818_s15, %s3334_s15   ;;  %s2766_s14 = sphi %s2816_s14, %s3333_s14   ;;  %s2762_s13 = sphi %s2814_s13, %s3332_s13   ;;  %s2758_s12 = sphi %s2812_s12, %s3331_s12  }
   0x6   : > { %s25_s22 = sadd.s32 1, %s2778_s17  ;;  %s28_s23 = sadd.s32 1, %s2782_s18 }
   0x7   : > { %p26_p0 = scmp.ge.s32.totalorder %s25_s22, 2  ;;  %p115_p1 = scmp.ne.s32.totalorder %s2766_s14, %s2762_s13 }
   0x8   : > { %p116_p2 = scmp.eq.s32.totalorder %s1943_s20, 3  ;;  %p121_p5 = scmp.ne.s32.totalorder %s2762_s13, %s2758_s12 }
   0x9   : > { %s3339_s22 = smov (%p26_p0, %s25_s22), 0  ;;  %s3341_s23 = smov (!%p26_p0, %s28_s23), %s2782_s18 }
   0xa   : > { %s101_s24 = ssub.s32 %s2778_s17, %s3339_s22  ;;  %p2863_p3 = por %p116_p2, %p115_p1 }
   0xb   : > { %p30_p4 = scmp.ge.s32.totalorder %s3341_s23, 2  ;;  %p122_p6 = scmp.eq.s32.totalorder %s1944_s21, 3 }
   0xc   : > { %p1947_p7 = scmp.ge.s32.totalorder %s2786_s19, 1  ;;  %p154_p9 = scmp.lt.s32.totalorder %s2786_s19, 5 }
   0xd   : > { %s3343_s23 = smov (%p30_p4, %s3341_s23), 0  ;;  %p2872_p8 = por %p122_p6, %p121_p5 }
   0xe   : > { %s100_s27 = ssub.s32 %s2782_s18, %s3343_s23  ;;  %s105_s28 = sadd.s32 1, %s2766_s14 }
   0xf   : > { %s102_s29 = sor.u32 %s101_s24, %s100_s27  ;;  %p155_p10 = pnand %p1947_p7, %p154_p9 }
  0x10   : > { %p103_p11 = scmp.eq.s32.totalorder %s102_s29, 0  ;;  %v2886_v0 = vld [vmem:[%s3324_s1 + $0x10] sm:$0xff] (!%p155_p10)  ;;  %v1965_v1 = vld [vmem:[%s3324_s1 + $0x18] sm:$0xf] (!%p155_p10)  ;;  %vm240_vm0 = vcmask (!%p155_p10), 1043456   ;;  %v2894_v2 = vld [vmem:[%s3324_s1 + $0x40] sm:$0xff] (!%p155_p10) }
  0x11   : > { %158 = sbr.rel (%p155_p10) target bundleno = 354 (0x162), region = 32  ;;  %v2481_v3 = vpack.c.bf16 (!%p155_p10), %v1965_v1, %v2886_v0  ;;  %vm2788_vm1 = vmmov (!%p155_p10), 1   ;;  %v1985_v5 = vld [vmem:[%s3324_s1 + $0x48] sm:$0xf] (!%p155_p10)  ;;  %p178_p12 = scmp.lt.s32.totalorder (!%p155_p10), %s2774_s16, 1  ;;  %v2908_v6 = vld [vmem:[%s3324_s1] sm:$0xff] (!%p155_p10) }
  0x12   : > { %s2881_s30 = scalar_select %p103_p11, %s2766_s14, %s105_s28  }
  0x13   : > { %vm2897_vm2 = vmpackc.low (!%p155_p10), %vm240_vm0, %vm2788_vm1  ;;  %v2493_v7 = vpack.c.bf16 (!%p155_p10), %v1985_v5, %v2894_v2  ;;  %v197_v8 = vld [vmem:[%s3324_s1 + $0x8] sm:$0xf] (!%p155_p10)  ;;  %v2917_v9 = vld [vmem:[%s3324_s1 + $0x30] sm:$0xff] (!%p155_p10)  ;;  %s2162_s8 = sshll.u32 (!%p155_p10), %s2770_s15, 7  ;;  %vm215_vm3 = vcmask (!%p155_p10), 97280   ;;  %s175_s5 = sand.u32 (!%p155_p10), 1, %s2762_s13  }
  0x14   : > { %v1953_v10 = vld [vmem:[%s3324_s1 + $0x38] sm:$0xf] (!%p155_p10)  ;;  %2483 = vmatprep.subr.msk.bf16.mxu0 (!%p155_p10), %vm2897_vm2, %v2481_v3  ;;  %v2487_v11 = vpack.c.bf16 (!%p155_p10), %v197_v8, %v2908_v6  ;;  %v2941_v13 = vld [vmem:[%s3324_s1 + $0x20] sm:$0xff] (!%p155_p10)  ;;  %v2015_v14 = vld [vmem:[%s3324_s1 + $0x28] sm:$0xf] (!%p155_p10)  ;;  %vm987_vm4 = vcmask (!%p155_p10), 523264  }
  0x15   : > { %v2499_v12 = vpack.c.bf16 (!%p155_p10), %v1953_v10, %v2917_v9  ;;  %2495 = vmatprep.subr.msk.bf16.mxu1 (!%p155_p10), %vm2897_vm2, %v2493_v7  ;;  %2486 = vmatpush3.bf16.msk.msra.mxu0 (!%p155_p10), %vm2897_vm2, %v2481_v3  ;;  %v2952_v15 = vld [vmem:[%s3324_s1 + $0x50] sm:$0xff] (!%p155_p10)  ;;  %v2026_v16 = vld [vmem:[%s3324_s1 + $0x58] sm:$0xf] (!%p155_p10)  ;;  %v2505_v20 = vpack.c.bf16 (!%p155_p10), %v2015_v14, %v2941_v13  ;;  %v2088_v29 = vld [vmem:[%s3324_s1 + $0x48] sm:$0xf] (!%p155_p10)  ;;  %s2168_s10 = sshll.u32 (!%p155_p10), %s2770_s15, 5 }
  0x16   : > { %2498 = vmatpush3.bf16.msk.msra.mxu1 (!%p155_p10), %vm2897_vm2, %v2493_v7  ;;  %2489 = vmatprep.subr.msk.bf16.mxu0 (!%p155_p10), %vm2897_vm2, %v2487_v11  ;;  %v2511_v21 = vpack.c.bf16 (!%p155_p10), %v2026_v16, %v2952_v15  ;;  %v2068_v28 = vld [vmem:[%s3324_s1 + $0x18] sm:$0xf] (!%p155_p10)  ;;  %v2529_v32 = vpack.c.bf16 (!%p155_p10), %v2088_v29, %v2894_v2  ;;  %v1025_v33 = vld [vmem:[%s3324_s1 + $0x8] sm:$0xf] (!%p155_p10)  ;;  %v3159_v51 = vld [vmem:[%s3325_s2] ss:$0 sm:$0xff] (!%p155_p10) }
  0x17   : > { %2501 = vmatprep.subr.msk.bf16.mxu1 (!%p155_p10), %vm2897_vm2, %v2499_v12  ;;  %v2517_v31 = vpack.c.bf16 (!%p155_p10), %v2068_v28, %v2886_v0  ;;  %v2056_v34 = vld [vmem:[%s3324_s1 + $0x38] sm:$0xf] (!%p155_p10)  ;;  %v2523_v35 = vpack.c.bf16 (!%p155_p10), %v1025_v33, %v2908_v6  ;;  %v2118_v39 = vld [vmem:[%s3324_s1 + $0x28] sm:$0xf] (!%p155_p10)  ;;  %s2158_s11 = sshll.u32 (!%p155_p10), %s2774_s16, 6  ;;  %s3271_s28 = scalar_lea.sflag (!%p155_p10), [#allocation3], %s175_s5 }
  0x18   : > { %s179_s6 = scalar_select %p178_p12, %s2774_s16, 1  ;;  %v2535_v36 = vpack.c.bf16 %v2056_v34, %v2917_v9  ;;  %v2129_v40 = vld [vmem:[%s3324_s1 + $0x58] sm:$0xf]  ;;  %v2541_v42 = vpack.c.bf16 %v2118_v39, %v2941_v13 }
  0x19   : > { %v2547_v43 = vpack.c.bf16 %v2129_v40, %v2952_v15  ;;  %s1842_s15 = sadd.s32 %s2168_s10, %s2158_s11  ;;  %s2789_s4 = smov [#allocation2]  }
  0x1a   : > { %s2617_s7 = smul.u32 288, %s179_s6  ;;  %s2159_s16 = sshll.u32 %s1842_s15, 7 }
  0x1b   : > { %s3255_s27 = scalar_lea.hbm %s3326_s3, %s2159_s16 }
  0x1c   : > { %s182_s21 = scalar_lea.vmem %s3323_s0, %s2617_s7  ;;  %s1948_s7 = sshll.u32 %s175_s5, 8 }
  0x1d   : > { %s2957_s6 = scalar_lea.vmem %s182_s21, %s2162_s8 }
  0x1e   : > { %v1956_v17 = vld [vmem:[%s2957_s6 + $0x10] sm:$0xff]  ;;  %v1957_v18 = vld [vmem:[%s2957_s6 + $0x18] sm:$0xff]  ;;  %v1958_v19 = vld [vmem:[%s2957_s6 + $0x20] sm:$0xff] }
  0x1f   : > { %2293 = vmatprep.mubr.msk.f32.mxu0 %vm215_vm3, %v1956_v17  ;;  %2325 = vmatprep.mubr.msk.f32.mxu1 %vm215_vm3, %v1956_v17  ;;  %v1959_v22 = vld [vmem:[%s2957_s6 + $0x28] sm:$0xff]  ;;  %v1960_v23 = vld [vmem:[%s2957_s6 + $0x30] sm:$0xff]  ;;  %v1961_v24 = vld [vmem:[%s2957_s6 + $0x38] sm:$0xff] }
  0x20   : > { %2294 = vmatmul.mubr.msk.f32.vlgmr.msra.gmra.mrb[0].mxu0 %vm215_vm3, %v1957_v18  ;;  %2326 = vmatmul.mubr.msk.f32.vlgmr.msra.gmra.mrb[0].mxu1 %vm215_vm3, %v1957_v18  ;;  %v2986_v25 = vld [vmem:[%s2957_s6 + $0x40] sm:$0xff]  ;;  %v2995_v26 = vld [vmem:[%s2957_s6 + $0x48] sm:$0xff]  ;;  %v2012_v37 = vld [vmem:[%s2957_s6 + $0x50] sm:$0xff] }
  0x21   : > { %2492 = vmatpush3.bf16.msk.msra.mxu0 %vm2897_vm2, %v2487_v11  ;;  %2504 = vmatpush3.bf16.msk.msra.mxu1 %vm2897_vm2, %v2499_v12  ;;  %v188_v27 = vld [vmem:[%s2957_s6] sm:$0xff]  ;;  %v189_v30 = vld [vmem:[%s2957_s6 + $0x8] sm:$0xff]  ;;  %v2013_v38 = vld [vmem:[%s2957_s6 + $0x58] sm:$0xff] }
  0x22   : > { %2296 = vmatprep.mubr.msk.f32.mxu0 %vm215_vm3, %v1958_v19  ;;  %2328 = vmatprep.mubr.msk.f32.mxu1 %vm215_vm3, %v1958_v19  ;;  %v2061_v41 = vld [vmem:[%s2957_s6 + $0x60] sm:$0xff]  ;;  %v2062_v44 = vld [vmem:[%s2957_s6 + $0x68] sm:$0xff]  ;;  %v2063_v45 = vld [vmem:[%s2957_s6 + $0x70] sm:$0xff] }
  0x23   : > { %2507 = vmatprep.subr.msk.bf16.mxu0 %vm2897_vm2, %v2505_v20  ;;  %2513 = vmatprep.subr.msk.bf16.mxu1 %vm2897_vm2, %v2511_v21  ;;  %v2064_v46 = vld [vmem:[%s2957_s6 + $0x78] sm:$0xff]  ;;  %v2065_v47 = vld [vmem:[%s2957_s6 + $0x80] sm:$0xff]  ;;  %v2066_v48 = vld [vmem:[%s2957_s6 + $0x88] sm:$0xff] }
  0x24   : > { %2297 = vmatmul.mubr.msk.f32.gmra.mrb[2].mxu0 %vm215_vm3, %v1959_v22  ;;  %2329 = vmatmul.mubr.msk.f32.gmra.mrb[2].mxu1 %vm215_vm3, %v1959_v22  ;;  %v2115_v49 = vld [vmem:[%s2957_s6 + $0x90] sm:$0xff]  ;;  %v2116_v50 = vld [vmem:[%s2957_s6 + $0x98] sm:$0xff]  ;;  %s3165_s6 = scalar_lea.vmem [#allocation2], %s1948_s7  ;;  %s2696_s7 = sshll.u32 %s2789_s4, 4  ;;  %s2697_s7 = int_to_ptr.vmem [resolvable:$false] %s2696_s7 }
  0x25   : > { %2299 = vmatprep.mubr.msk.f32.mxu0 %vm215_vm3, %v1960_v23  ;;  %2331 = vmatprep.mubr.msk.f32.mxu1 %vm215_vm3, %v1960_v23  ;;  %s1845_s20 = sshll.u32 %s3165_s6, 4  ;;  %s2698_s8 = scalar_lea.vmem %s2697_s7, 8192  ;;  %s3257_s20 = int_to_ptr.vmem [resolvable:$true] %s1845_s20 }
  0x26   : > { %s2692_s29 = scalar_lea.vmem %s3257_s20, 4096  ;;  %p2699_p2 = scmp.lt.s32.totalorder %s3257_s20, %s2697_s7 }
  0x27   : > { %p2693_p13 = scmp.ne.s32.totalorder %s3257_s20, %s2692_s29  ;;  %p2700_p4 = scmp.lt.s32.totalorder %s2698_s8, %s2692_s29 }
  0x28   : > { %2300 = vmatmul.mubr.msk.f32.gmra.mrb[4].mxu0 %vm215_vm3, %v1961_v24  ;;  %2332 = vmatmul.mubr.msk.f32.gmra.mrb[4].mxu1 %vm215_vm3, %v1961_v24 }
  0x29   : > { %2302 = vmatprep.mubr.msk.f32.mxu0 %vm215_vm3, %v2986_v25  ;;  %2334 = vmatprep.mubr.msk.f32.mxu1 %vm215_vm3, %v2986_v25  ;;  %p2694_p0 = pnand %p2693_p13, %p2863_p3  ;;  %p2701_p5 = por %p2700_p4, %p2699_p2 }
  0x2b   : > { %p2695_p1 = pneg %p2694_p0 }
  0x2c   : > { %2303 = vmatmul.mubr.msk.f32.gmra.mrb[6].mxu0 %vm215_vm3, %v2995_v26  ;;  %2335 = vmatmul.mubr.msk.f32.gmra.mrb[6].mxu1 %vm215_vm3, %v2995_v26 }
  0x2d   : > { %2309 = vmatprep.mubr.msk.f32.mxu0 %vm215_vm3, %v188_v27  ;;  %2341 = vmatprep.mubr.msk.f32.mxu1 %vm215_vm3, %v188_v27  ;;  %p2702_p6 = pnand %p2701_p5, %p2695_p1 }
  0x30   : > { %2310 = vmatmul.mubr.msk.f32.vlgmr.msra.gmra.mrb[0].mxu0 %vm215_vm3, %v189_v30  ;;  %2342 = vmatmul.mubr.msk.f32.vlgmr.msra.gmra.mrb[0].mxu1 %vm215_vm3, %v189_v30 }
  0x31   : > { %2510 = vmatpush3.bf16.msk.msra.mxu0 %vm2897_vm2, %v2505_v20  ;;  %2516 = vmatpush3.bf16.msk.msra.mxu1 %vm2897_vm2, %v2511_v21 }
  0x32   : > { %2312 = vmatprep.mubr.msk.f32.mxu0 %vm215_vm3, %v1956_v17  ;;  %2344 = vmatprep.mubr.msk.f32.mxu1 %vm215_vm3, %v1956_v17 }
  0x33   : > { %2519 = vmatprep.subr.msk.bf16.mxu0 %vm2897_vm2, %v2517_v31  ;;  %2531 = vmatprep.subr.msk.bf16.mxu1 %vm2897_vm2, %v2529_v32 }
  0x34   : > { %2313 = vmatmul.mubr.msk.f32.gmra.mrb[2].mxu0 %vm215_vm3, %v1957_v18  ;;  %2345 = vmatmul.mubr.msk.f32.gmra.mrb[2].mxu1 %vm215_vm3, %v1957_v18 }
  0x35   : > { %2315 = vmatprep.mubr.msk.f32.mxu0 %vm215_vm3, %v1958_v19  ;;  %2347 = vmatprep.mubr.msk.f32.mxu1 %vm215_vm3, %v1958_v19 }
  0x38   : > { %2316 = vmatmul.mubr.msk.f32.gmra.mrb[4].mxu0 %vm215_vm3, %v1959_v22  ;;  %2348 = vmatmul.mubr.msk.f32.gmra.mrb[4].mxu1 %vm215_vm3, %v1959_v22 }
  0x39   : > { %2318 = vmatprep.mubr.msk.f32.mxu0 %vm215_vm3, %v1960_v23  ;;  %2350 = vmatprep.mubr.msk.f32.mxu1 %vm215_vm3, %v1960_v23 }
  0x3c   : > { %2319 = vmatmul.mubr.msk.f32.gmra.mrb[6].mxu0 %vm215_vm3, %v1961_v24  ;;  %2351 = vmatmul.mubr.msk.f32.gmra.mrb[6].mxu1 %vm215_vm3, %v1961_v24 }
  0x3d   : > { %2357 = vmatprep.mubr.msk.f32.mxu0 %vm215_vm3, %v1958_v19  ;;  %2373 = vmatprep.mubr.msk.f32.mxu1 %vm215_vm3, %v1958_v19 }
  0x40   : > { %2358 = vmatmul.mubr.msk.f32.vlgmr.msra.gmra.mrb[0].mxu0 %vm215_vm3, %v1959_v22  ;;  %2374 = vmatmul.mubr.msk.f32.vlgmr.msra.gmra.mrb[0].mxu1 %vm215_vm3, %v1959_v22 }
  0x41   : > { %2522 = vmatpush3.bf16.msk.msra.mxu0 %vm2897_vm2, %v2517_v31  ;;  %2534 = vmatpush3.bf16.msk.msra.mxu1 %vm2897_vm2, %v2529_v32 }
  0x42   : > { %2360 = vmatprep.mubr.msk.f32.mxu0 %vm215_vm3, %v1960_v23  ;;  %2376 = vmatprep.mubr.msk.f32.mxu1 %vm215_vm3, %v1960_v23 }
  0x43   : > { %2525 = vmatprep.subr.msk.bf16.mxu0 %vm2897_vm2, %v2523_v35  ;;  %2537 = vmatprep.subr.msk.bf16.mxu1 %vm2897_vm2, %v2535_v36 }
  0x44   : > { %2361 = vmatmul.mubr.msk.f32.gmra.mrb[2].mxu0 %vm215_vm3, %v1961_v24  ;;  %2377 = vmatmul.mubr.msk.f32.gmra.mrb[2].mxu1 %vm215_vm3, %v1961_v24 }
  0x45   : > { %2363 = vmatprep.mubr.msk.f32.mxu0 %vm215_vm3, %v2986_v25  ;;  %2379 = vmatprep.mubr.msk.f32.mxu1 %vm215_vm3, %v2986_v25 }
  0x48   : > { %2364 = vmatmul.mubr.msk.f32.gmra.mrb[4].mxu0 %vm215_vm3, %v2995_v26  ;;  %2380 = vmatmul.mubr.msk.f32.gmra.mrb[4].mxu1 %vm215_vm3, %v2995_v26 }
  0x49   : > { %2366 = vmatprep.mubr.msk.f32.mxu0 %vm215_vm3, %v2012_v37  ;;  %2382 = vmatprep.mubr.msk.f32.mxu1 %vm215_vm3, %v2012_v37 }
  0x4c   : > { %2367 = vmatmul.mubr.msk.f32.gmra.mrb[6].mxu0 %vm215_vm3, %v2013_v38  ;;  %2383 = vmatmul.mubr.msk.f32.gmra.mrb[6].mxu1 %vm215_vm3, %v2013_v38 }
  0x4d   : > { %2389 = vmatprep.mubr.msk.f32.mxu0 %vm215_vm3, %v2012_v37  ;;  %2421 = vmatprep.mubr.msk.f32.mxu1 %vm215_vm3, %v2012_v37 }
  0x50   : > { %2390 = vmatmul.mubr.msk.f32.vlgmr.msra.gmra.mrb[8].mxu0 %vm215_vm3, %v2013_v38  ;;  %2422 = vmatmul.mubr.msk.f32.vlgmr.msra.gmra.mrb[8].mxu1 %vm215_vm3, %v2013_v38 }
  0x51   : > { %2528 = vmatpush3.bf16.msk.msra.mxu0 %vm2897_vm2, %v2523_v35  ;;  %2540 = vmatpush3.bf16.msk.msra.mxu1 %vm2897_vm2, %v2535_v36 }
  0x52   : > { %2392 = vmatprep.mubr.msk.f32.mxu0 %vm215_vm3, %v2061_v41  ;;  %2424 = vmatprep.mubr.msk.f32.mxu1 %vm215_vm3, %v2061_v41 }
  0x53   : > { %2543 = vmatprep.subr.msk.bf16.mxu0 %vm2897_vm2, %v2541_v42  ;;  %2549 = vmatprep.subr.msk.bf16.mxu1 %vm2897_vm2, %v2547_v43 }
  0x54   : > { %2393 = vmatmul.mubr.msk.f32.gmra.mrb[10].mxu0 %vm215_vm3, %v2062_v44  ;;  %2425 = vmatmul.mubr.msk.f32.gmra.mrb[10].mxu1 %vm215_vm3, %v2062_v44 }
  0x55   : > { %2395 = vmatprep.mubr.msk.f32.mxu0 %vm215_vm3, %v2063_v45  ;;  %2427 = vmatprep.mubr.msk.f32.mxu1 %vm215_vm3, %v2063_v45 }
  0x58   : > { %2396 = vmatmul.mubr.msk.f32.gmra.mrb[12].mxu0 %vm215_vm3, %v2064_v46  ;;  %2428 = vmatmul.mubr.msk.f32.gmra.mrb[12].mxu1 %vm215_vm3, %v2064_v46 }
  0x59   : > { %2398 = vmatprep.mubr.msk.f32.mxu0 %vm215_vm3, %v2065_v47  ;;  %2430 = vmatprep.mubr.msk.f32.mxu1 %vm215_vm3, %v2065_v47 }
  0x5c   : > { %2399 = vmatmul.mubr.msk.f32.gmra.mrb[14].mxu0 %vm215_vm3, %v2066_v48  ;;  %2431 = vmatmul.mubr.msk.f32.gmra.mrb[14].mxu1 %vm215_vm3, %v2066_v48 }
  0x5d   : > { %2405 = vmatprep.mubr.msk.f32.mxu0 %vm215_vm3, %v2986_v25  ;;  %2437 = vmatprep.mubr.msk.f32.mxu1 %vm215_vm3, %v2986_v25 }
  0x60   : > { %2406 = vmatmul.mubr.msk.f32.vlgmr.msra.gmra.mrb[8].mxu0 %vm215_vm3, %v2995_v26  ;;  %2438 = vmatmul.mubr.msk.f32.vlgmr.msra.gmra.mrb[8].mxu1 %vm215_vm3, %v2995_v26 }
  0x61   : > { %2546 = vmatpush3.bf16.msk.msra.mxu0 %vm2897_vm2, %v2541_v42  ;;  %2552 = vmatpush3.bf16.msk.msra.mxu1 %vm2897_vm2, %v2547_v43 }
  0x62   : > { %2408 = vmatprep.mubr.msk.f32.mxu0 %vm215_vm3, %v2012_v37  ;;  %2440 = vmatprep.mubr.msk.f32.mxu1 %vm215_vm3, %v2012_v37 }
  0x64   : > { %2409 = vmatmul.mubr.msk.f32.gmra.mrb[10].mxu0 %vm215_vm3, %v2013_v38  ;;  %2441 = vmatmul.mubr.msk.f32.gmra.mrb[10].mxu1 %vm215_vm3, %v2013_v38 }
  0x65   : > { %2411 = vmatprep.mubr.msk.f32.mxu0 %vm215_vm3, %v2061_v41  ;;  %2443 = vmatprep.mubr.msk.f32.mxu1 %vm215_vm3, %v2061_v41 }
  0x68   : > { %2412 = vmatmul.mubr.msk.f32.gmra.mrb[12].mxu0 %vm215_vm3, %v2062_v44  ;;  %2444 = vmatmul.mubr.msk.f32.gmra.mrb[12].mxu1 %vm215_vm3, %v2062_v44 }
  0x69   : > { %2414 = vmatprep.mubr.msk.f32.mxu0 %vm215_vm3, %v2063_v45  ;;  %2446 = vmatprep.mubr.msk.f32.mxu1 %vm215_vm3, %v2063_v45 }
  0x6c   : > { %2415 = vmatmul.mubr.msk.f32.gmra.mrb[14].mxu0 %vm215_vm3, %v2064_v46  ;;  %2447 = vmatmul.mubr.msk.f32.gmra.mrb[14].mxu1 %vm215_vm3, %v2064_v46 }
  0x6d   : > { %2453 = vmatprep.mubr.msk.f32.mxu0 %vm215_vm3, %v2061_v41  ;;  %2469 = vmatprep.mubr.msk.f32.mxu1 %vm215_vm3, %v2061_v41 }
  0x70   : > { %2454 = vmatmul.mubr.msk.f32.vlgmr.msra.gmra.mrb[8].mxu0 %vm215_vm3, %v2062_v44  ;;  %2470 = vmatmul.mubr.msk.f32.vlgmr.msra.gmra.mrb[8].mxu1 %vm215_vm3, %v2062_v44 }
  0x71   : > { %2456 = vmatprep.mubr.msk.f32.mxu0 %vm215_vm3, %v2063_v45  ;;  %2472 = vmatprep.mubr.msk.f32.mxu1 %vm215_vm3, %v2063_v45 }
  0x74   : > { %2457 = vmatmul.mubr.msk.f32.gmra.mrb[10].mxu0 %vm215_vm3, %v2064_v46  ;;  %2473 = vmatmul.mubr.msk.f32.gmra.mrb[10].mxu1 %vm215_vm3, %v2064_v46 }
  0x75   : > { %2459 = vmatprep.mubr.msk.f32.mxu0 %vm215_vm3, %v2065_v47  ;;  %2475 = vmatprep.mubr.msk.f32.mxu1 %vm215_vm3, %v2065_v47 }
  0x78   : > { %2460 = vmatmul.mubr.msk.f32.gmra.mrb[12].mxu0 %vm215_vm3, %v2066_v48  ;;  %2476 = vmatmul.mubr.msk.f32.gmra.mrb[12].mxu1 %vm215_vm3, %v2066_v48 }
  0x79   : > { %2462 = vmatprep.mubr.msk.f32.mxu0 %vm215_vm3, %v2115_v49  ;;  %2478 = vmatprep.mubr.msk.f32.mxu1 %vm215_vm3, %v2115_v49 }
  0x7c   : > { %2463 = vmatmul.mubr.msk.f32.gmra.mrb[14].mxu0 %vm215_vm3, %v2116_v50  ;;  %2479 = vmatmul.mubr.msk.f32.gmra.mrb[14].mxu1 %vm215_vm3, %v2116_v50 }
 0x113   : > { %v2359_v52 = vpop.f32.mrb[0].mxu0  ;;  %v2375_v53 = vpop.f32.mrb[0].mxu1 }
 0x114   : > { %v980_v54 = vadd.f32 %v2359_v52, %v3159_v51  ;;  %v997_v55 = vadd.f32 %v2375_v53, %v3159_v51  ;;  %v807_v56 = vpop.f32.mrb[1].mxu0  ;;  %v926_v57 = vpop.f32.mrb[1].mxu1 }
 0x115   : > { %v979_v58 = vadd.f32 %v3159_v51, %v807_v56  ;;  %v996_v59 = vadd.f32 %v3159_v51, %v926_v57 }
 0x116   : > { %989 = vst.msk [vmem:[%s3165_s6 + $0x8] sm:$0xff] %vm987_vm4, %v980_v54  ;;  %2038 = vst.msk [vmem:[%s3165_s6 + $0x18] sm:$0xff] %vm987_vm4, %v997_v55 }
 0x117   : > { %988 = vst.msk [vmem:[%s3165_s6] sm:$0xff] %vm987_vm4, %v979_v58  ;;  %2037 = vst.msk [vmem:[%s3165_s6 + $0x10] sm:$0xff] %vm987_vm4, %v996_v59  ;;  %v2362_v60 = vpop.f32.mrb[2].mxu0  ;;  %v2378_v61 = vpop.f32.mrb[2].mxu1 }
 0x118   : > { %v982_v62 = vadd.f32 %v2362_v60, %v3159_v51  ;;  %v999_v63 = vadd.f32 %v2378_v61, %v3159_v51  ;;  %v817_v0 = vpop.f32.mrb[3].mxu0  ;;  %v936_v1 = vpop.f32.mrb[3].mxu1 }
 0x119   : > { %v981_v2 = vadd.f32 %v3159_v51, %v817_v0  ;;  %v998_v3 = vadd.f32 %v3159_v51, %v936_v1 }
 0x11a   : > { %991 = vst.msk [vmem:[%s3165_s6 + $0x28] sm:$0xff] %vm987_vm4, %v982_v62  ;;  %2040 = vst.msk [vmem:[%s3165_s6 + $0x38] sm:$0xff] %vm987_vm4, %v999_v63 }
 0x11b   : > { %990 = vst.msk [vmem:[%s3165_s6 + $0x20] sm:$0xff] %vm987_vm4, %v981_v2  ;;  %2039 = vst.msk [vmem:[%s3165_s6 + $0x30] sm:$0xff] %vm987_vm4, %v998_v3  ;;  %v2365_v4 = vpop.f32.mrb[4].mxu0  ;;  %v2381_v5 = vpop.f32.mrb[4].mxu1 }
 0x11c   : > { %v984_v6 = vadd.f32 %v2365_v4, %v3159_v51  ;;  %v1001_v7 = vadd.f32 %v2381_v5, %v3159_v51  ;;  %v827_v8 = vpop.f32.mrb[5].mxu0  ;;  %v946_v9 = vpop.f32.mrb[5].mxu1 }
 0x11d   : > { %v983_v10 = vadd.f32 %v3159_v51, %v827_v8  ;;  %v1000_v11 = vadd.f32 %v3159_v51, %v946_v9 }
 0x11e   : > { %993 = vst.msk [vmem:[%s3165_s6 + $0x48] sm:$0xff] %vm987_vm4, %v984_v6  ;;  %2042 = vst.msk [vmem:[%s3165_s6 + $0x58] sm:$0xff] %vm987_vm4, %v1001_v7 }
 0x11f   : > { %992 = vst.msk [vmem:[%s3165_s6 + $0x40] sm:$0xff] %vm987_vm4, %v983_v10  ;;  %2041 = vst.msk [vmem:[%s3165_s6 + $0x50] sm:$0xff] %vm987_vm4, %v1000_v11  ;;  %v2368_v12 = vpop.f32.mrb[6].mxu0  ;;  %v2384_v13 = vpop.f32.mrb[6].mxu1 }
 0x120   : > { %v986_v14 = vadd.f32 %v2368_v12, %v3159_v51  ;;  %v1003_v15 = vadd.f32 %v2384_v13, %v3159_v51  ;;  %v837_v16 = vpop.f32.mrb[7].mxu0  ;;  %v956_v17 = vpop.f32.mrb[7].mxu1 }
 0x121   : > { %v985_v18 = vadd.f32 %v3159_v51, %v837_v16  ;;  %v1002_v19 = vadd.f32 %v3159_v51, %v956_v17 }
 0x122   : > { %995 = vst.msk [vmem:[%s3165_s6 + $0x68] sm:$0xff] %vm987_vm4, %v986_v14  ;;  %2044 = vst.msk [vmem:[%s3165_s6 + $0x78] sm:$0xff] %vm987_vm4, %v1003_v15 }
 0x123   : > { %994 = vst.msk [vmem:[%s3165_s6 + $0x60] sm:$0xff] %vm987_vm4, %v985_v18  ;;  %2043 = vst.msk [vmem:[%s3165_s6 + $0x70] sm:$0xff] %vm987_vm4, %v1002_v19 }
 0x143   : > { %v2455_v20 = vpop.f32.mrb[8].mxu0  ;;  %v2471_v21 = vpop.f32.mrb[8].mxu1 }
 0x144   : > { %v1795_v22 = vadd.f32 %v2455_v20, %v3159_v51  ;;  %v1812_v23 = vadd.f32 %v2471_v21, %v3159_v51  ;;  %v1629_v24 = vpop.f32.mrb[9].mxu0  ;;  %v1747_v25 = vpop.f32.mrb[9].mxu1 }
 0x145   : > { %v1794_v26 = vadd.f32 %v3159_v51, %v1629_v24  ;;  %v1811_v27 = vadd.f32 %v3159_v51, %v1747_v25 }
 0x146   : > { %2140 = vst.msk [vmem:[%s3165_s6 + $0x88] sm:$0xff] %vm987_vm4, %v1795_v22  ;;  %2148 = vst.msk [vmem:[%s3165_s6 + $0x98] sm:$0xff] %vm987_vm4, %v1812_v23 }
 0x147   : > { %2139 = vst.msk [vmem:[%s3165_s6 + $0x80] sm:$0xff] %vm987_vm4, %v1794_v26  ;;  %2147 = vst.msk [vmem:[%s3165_s6 + $0x90] sm:$0xff] %vm987_vm4, %v1811_v27  ;;  %v2458_v28 = vpop.f32.mrb[10].mxu0  ;;  %v2474_v29 = vpop.f32.mrb[10].mxu1 }
 0x148   : > { %v1797_v30 = vadd.f32 %v2458_v28, %v3159_v51  ;;  %v1814_v31 = vadd.f32 %v2474_v29, %v3159_v51  ;;  %v1639_v32 = vpop.f32.mrb[11].mxu0  ;;  %v1757_v33 = vpop.f32.mrb[11].mxu1 }
 0x149   : > { %v1796_v34 = vadd.f32 %v3159_v51, %v1639_v32  ;;  %v1813_v35 = vadd.f32 %v3159_v51, %v1757_v33 }
 0x14a   : > { %2142 = vst.msk [vmem:[%s3165_s6 + $0xa8] sm:$0xff] %vm987_vm4, %v1797_v30  ;;  %2150 = vst.msk [vmem:[%s3165_s6 + $0xb8] sm:$0xff] %vm987_vm4, %v1814_v31 }
 0x14b   : > { %2141 = vst.msk [vmem:[%s3165_s6 + $0xa0] sm:$0xff] %vm987_vm4, %v1796_v34  ;;  %2149 = vst.msk [vmem:[%s3165_s6 + $0xb0] sm:$0xff] %vm987_vm4, %v1813_v35  ;;  %v2461_v36 = vpop.f32.mrb[12].mxu0  ;;  %v2477_v37 = vpop.f32.mrb[12].mxu1 }
 0x14c   : > { %v1799_v38 = vadd.f32 %v2461_v36, %v3159_v51  ;;  %v1816_v39 = vadd.f32 %v2477_v37, %v3159_v51  ;;  %v1649_v40 = vpop.f32.mrb[13].mxu0  ;;  %v1767_v41 = vpop.f32.mrb[13].mxu1 }
 0x14d   : > { %v1798_v42 = vadd.f32 %v3159_v51, %v1649_v40  ;;  %v1815_v43 = vadd.f32 %v3159_v51, %v1767_v41 }
 0x14e   : > { %2144 = vst.msk [vmem:[%s3165_s6 + $0xc8] sm:$0xff] %vm987_vm4, %v1799_v38  ;;  %2152 = vst.msk [vmem:[%s3165_s6 + $0xd8] sm:$0xff] %vm987_vm4, %v1816_v39 }
 0x14f   : > { %2143 = vst.msk [vmem:[%s3165_s6 + $0xc0] sm:$0xff] %vm987_vm4, %v1798_v42  ;;  %2151 = vst.msk [vmem:[%s3165_s6 + $0xd0] sm:$0xff] %vm987_vm4, %v1815_v43  ;;  %v2464_v44 = vpop.f32.mrb[14].mxu0  ;;  %v2480_v45 = vpop.f32.mrb[14].mxu1 }
 0x150   : > { %v1801_v46 = vadd.f32 %v2464_v44, %v3159_v51  ;;  %v1818_v47 = vadd.f32 %v2480_v45, %v3159_v51  ;;  %v1659_v48 = vpop.f32.mrb[15].mxu0  ;;  %v1777_v49 = vpop.f32.mrb[15].mxu1 }
 0x151   : > { %v1800_v50 = vadd.f32 %v3159_v51, %v1659_v48  ;;  %v1817_v52 = vadd.f32 %v3159_v51, %v1777_v49 }
 0x152   : > { %2146 = vst.msk [vmem:[%s3165_s6 + $0xe8] sm:$0xff] %vm987_vm4, %v1801_v46  ;;  %2154 = vst.msk [vmem:[%s3165_s6 + $0xf8] sm:$0xff] %vm987_vm4, %v1818_v47 }
 0x153   : > { %2145 = vst.msk [vmem:[%s3165_s6 + $0xe0] sm:$0xff] %vm987_vm4, %v1800_v50  ;;  %2153 = vst.msk [vmem:[%s3165_s6 + $0xf0] sm:$0xff] %vm987_vm4, %v1817_v52 }
 0x154   : > { %2705 = shalt.err (!%p2702_p6)
}
 0x155   : > { %s2706_s5 = scalar_lea.hbm %s3255_s27, 4096  ;;  %s2710_s10 = scalar_lea.hbm %s3326_s3, 16384 }
 0x156   : > { %p2707_p7 = scmp.ne.s32.totalorder %s3255_s27, %s2706_s5  ;;  %p2711_p11 = scmp.lt.u32.totalorder %s3255_s27, %s3326_s3 }
 0x157   : > { %p2712_p12 = scmp.lt.u32.totalorder %s2710_s10, %s2706_s5  ;;  %p2714_p0 = scmp.lt.u32.totalorder %s2706_s5, %s3255_s27 }
 0x158   : > { %p2708_p9 = pnand %p2707_p7, %p2863_p3 }
 0x159   : > { %p2713_p13 = por %p2712_p12, %p2711_p11 }
 0x15a   : > { %p2709_p10 = pneg %p2708_p9 }
 0x15b   : > { %p2715_p1 = por %p2714_p0, %p2713_p13 }
 0x15d   : > { %p2716_p2 = pnand %p2715_p1, %p2709_p10 }
 0x15f   : > { %2719 = shalt.err (!%p2716_p2)
}
 0x160   : > { %s2790_s16 = smov 128   ;;  %s2791_s21 = smov 8  }
 0x161   : > { %2618 = dma.vmem_to_hbm [thread:$0]  (%p2863_p3), %s3257_s20, 4096, %s3255_s27, %s3271_s28, %s2790_s16, %s2790_s16, %s2791_s21  }
 0x162 PF: > { %p2624_p4 = scmp.ge.s32.totalorder %s2786_s19, 2  ;;  %s1860_s24 = sand.u32 1, %s2758_s12  }
 0x163   : > { %s1861_s29 = scalar_lea.sflag [#allocation3], %s1860_s24 }
 0x164   : > { %p2621_p5 = pnand %p2624_p4, %p2872_p8 }
 0x166   : > { %2753 = dma.done.wait (!%p2621_p5), %s1861_s29, 4096  }
 0x167   : > { %2755 = vsyncadd (!%p2621_p5), %s1861_s29, 4294963200  ;;  %s16_s19 = sadd.s32 1, %s2786_s19   ;;  %s3331_s12 = smov %s2762_s13 }
 0x168   : > { %p13_p6 = scmp.ge.s32.totalorder %s16_s19, 6   ;;  %s3332_s13 = smov %s2766_s14 }
 0x169   : > { %s3333_s14 = smov %s2881_s30  ;;  %s3334_s15 = smov %s2778_s17 }
 0x16a   : > { %s3335_s16 = smov %s2782_s18  ;;  %s3336_s17 = smov %s3339_s22 }
 0x16b   : > { %s3337_s18 = smov %s3343_s23  ;;  %15 = sbr.rel (!%p13_p6) target bundleno = 5 (0x5), region = 81 }
 0x172   :  { %1866 = vsyncpa [#allocation3], 1 }
 0x173   :  { %1868 = vsyncpa [#allocation3 + $0x1], 1 }

</bundles_post_ra>
